<compile_context>
chip_gen: v6e
topology: v6e:2x2x1
jax: 0.10.0
libtpu: 0.0.40
codegen_flags: <defaults>
</compile_context>

<pallas_src>
import functools

import jax
import jax.numpy as jnp
from jax.experimental import pallas as pl
from jax.experimental.pallas import tpu as pltpu


def _inter_class_sep_kernel(scores_ref, labels_ref, out_ref, *,
                            num_old_classes, K, margin, batch, tile_b):
    """One batch tile.

    scores_ref : (TB, C)     native dtype (loop runs in this dtype)
    labels_ref : (TB, 1)     int32
    out_ref    : (1, 8, 128) f32; sublane 0 = partial hinge-loss sum,
                                  sublane 1 = partial hard-sample count.
    """
    i = pl.program_id(0)
    scores = scores_ref[...]                         # (TB, C) native dtype
    labels = labels_ref[...]                         # (TB, 1) int32
    TB, C = scores.shape
    dt = scores.dtype

    # (1, C) column iota; broadcasting supplies the row dimension everywhere.
    col = jax.lax.broadcasted_iota(jnp.int32, (1, C), 1)

    # Ground-truth score per row: one-hot select + row-sum (exact: one nonzero
    # per row), then cast the tiny (TB,1) result to f32.
    zero = jnp.array(0, dtype=dt)
    gt = jnp.sum(jnp.where(col == labels, scores, zero),
                 axis=-1, keepdims=True).astype(jnp.float32)      # (TB, 1)

    NEG = jnp.array(jnp.finfo(dt).min, dtype=dt)
    margin_f = jnp.float32(margin)

    # top-K over novel columns: carry the masked array directly; each round
    # removes the FIRST occurrence of the current max (torch.topk value
    # semantics with duplicates).  K is small & static -> unrolled.
    masked = jnp.where(col >= num_old_classes, scores, NEG)       # (TB, C)
    hinge = jnp.zeros((TB, 1), jnp.float32)
    for _ in range(K):
        cur = jnp.max(masked, axis=-1, keepdims=True)             # (TB, 1)
        # MarginRankingLoss(x1=gt, x2=cur, y=1): max(0, margin - gt + cur)
        hinge = hinge + jnp.maximum(
            margin_f - gt + cur.astype(jnp.float32), 0.0)
        first = jnp.min(jnp.where(masked == cur, col, C),
                        axis=-1, keepdims=True)                   # (TB, 1)
        masked = jnp.where(col == first, NEG, masked)

    # Hard rows = label is an old class; also mask rows past the true batch
    # size (the last tile of an uneven grid reads padding).  Keep this a
    # select so garbage/NaN in padded rows cannot propagate.
    row = jax.lax.broadcasted_iota(jnp.int32, (TB, 1), 0)
    valid = (i * tile_b + row) < batch
    hard = jnp.logical_and(labels < num_old_classes, valid)

    tile_loss = jnp.sum(jnp.where(hard, hinge, 0.0))              # scalar f32
    tile_cnt = jnp.sum(jnp.where(hard, 1.0, 0.0))                 # scalar f32

    # Fold both partials into one lane/sublane aligned (8,128) block so the
    # store is unmasked and the grid axis stays "parallel".
    sub = jax.lax.broadcasted_iota(jnp.int32, (8, 128), 0)
    blk = jnp.where(sub == 0, tile_loss, jnp.where(sub == 1, tile_cnt, 0.0))
    out_ref[...] = jnp.broadcast_to(blk, out_ref.shape)


def _pick_tile_b(B, C, itemsize):
    """Largest batch tile (multiple of 8, <=2048) whose working set fits VMEM.

    Per-row budget: 2x double-buffered native input tile plus ~3 native-dtype
    full-width temporaries (masked copy, compare/select intermediates).  The
    24 MiB budget leaves headroom under v7x's 64 MiB physical VMEM (and is
    well within v5e/v6e's 128 MiB) once the raised vmem limit is applied.
    """
    per_row = C * itemsize * 5 + 64
    budget = 24 * 1024 * 1024
    cap = min(max(budget // per_row, 8), 2048)
    if B <= cap:
        return B
    return max(8, (int(cap) // 8) * 8)


def inter_class_separation(scores, labels, num_old_classes, *, K, weight, margin):
    """JAX/Pallas equivalent of InterClassSeparation.forward."""
    B, C = scores.shape
    num_novel = C - int(num_old_classes)
    if not (0 < int(K) <= num_novel):
        raise ValueError("K must be in (0, num_novel_classes]")

    tile_b = _pick_tile_b(B, C, scores.dtype.itemsize)
    num_tiles = int(pl.cdiv(B, tile_b))

    labels2d = labels.astype(jnp.int32).reshape(B, 1)

    kernel = functools.partial(
        _inter_class_sep_kernel,
        num_old_classes=int(num_old_classes), K=int(K), margin=float(margin),
        batch=B, tile_b=tile_b)

    bytes_accessed = (scores.size * scores.dtype.itemsize
                      + labels2d.size * 4
                      + num_tiles * 8 * 128 * 4)
    cost = pl.CostEstimate(flops=int(B * C * (4 + 5 * int(K))),
                           transcendentals=0,
                           bytes_accessed=int(bytes_accessed))

    parts = pl.pallas_call(
        kernel,
        out_shape=jax.ShapeDtypeStruct((num_tiles, 8, 128), jnp.float32),
        grid=(num_tiles,),
        in_specs=[pl.BlockSpec((tile_b, C), lambda i: (i, 0)),
                  pl.BlockSpec((tile_b, 1), lambda i: (i, 0))],
        out_specs=pl.BlockSpec((1, 8, 128), lambda i: (i, 0, 0)),
        compiler_params=pltpu.CompilerParams(
            dimension_semantics=("parallel",),
            vmem_limit_bytes=48 * 1024 * 1024),
        cost_estimate=cost,
    )(scores, labels2d)

    loss_sum = jnp.sum(parts[:, 0, 0])
    hard_cnt = jnp.sum(parts[:, 1, 0])
    denom = jnp.maximum(hard_cnt * jnp.float32(K), jnp.float32(1.0))
    loss = jnp.where(hard_cnt > 0, loss_sum / denom, jnp.float32(0.0))

    # Keep JAX scalars in the log (no forced device sync; jit-safe). The torch
    # module logs the unweighted loss and returns the weighted one.
    log = {'InterClassLoss': loss}
    return loss * jnp.float32(weight), log


def _reference(scores, labels, num_old_classes, K, weight, margin):
    """Pure-JAX reference of the torch forward for correctness checking."""
    scores = scores.astype(jnp.float32)
    gt = jnp.take_along_axis(scores, labels[:, None].astype(jnp.int32), axis=1)
    topk = jax.lax.top_k(scores[:, num_old_classes:], K)[0]
    hard = (labels < num_old_classes)[:, None]
    hinge = jnp.maximum(margin - gt + topk, 0.0)
    hard_num = jnp.sum(hard)
    denom = jnp.maximum(hard_num * K, 1).astype(jnp.float32)
    loss = jnp.where(hard_num > 0,
                     jnp.sum(jnp.where(hard, hinge, 0.0)) / denom,
                     jnp.float32(0.0))
    return loss * weight


if __name__ == "__main__":
    key = jax.random.PRNGKey(0)

    # Small shapes consistent with the module: batch=8, 12 total classes of
    # which 8 are "old" and 4 are "novel"; top-K=2.
    num_old_classes = 8
    num_classes = 12
    K = 2
    margin = 0.5
    weight = 1.0

    k1, k2 = jax.random.split(key)
    scores = jax.random.normal(k1, (8, num_classes), dtype=jnp.float32)
    labels = jax.random.randint(k2, (8,), 0, num_classes, dtype=jnp.int32)

    loss, log = inter_class_separation(
        scores, labels, num_old_classes, K=K, weight=weight, margin=margin)
    loss = jax.block_until_ready(loss)
    ref = _reference(scores, labels, num_old_classes, K, weight, margin)
    assert jnp.allclose(loss, ref, atol=1e-5, rtol=1e-5), (loss, ref)

    # Second check exercising the multi-tile path (partial last tile masking).
    k3, k4 = jax.random.split(jax.random.PRNGKey(1))
    scores2 = jax.random.normal(k3, (2500, num_classes), dtype=jnp.float32)
    labels2 = jax.random.randint(k4, (2500,), 0, num_classes, dtype=jnp.int32)
    loss2, _ = inter_class_separation(
        scores2, labels2, num_old_classes, K=K, weight=weight, margin=margin)
    loss2 = jax.block_until_ready(loss2)
    ref2 = _reference(scores2, labels2, num_old_classes, K, weight, margin)
    assert jnp.allclose(loss2, ref2, atol=1e-5, rtol=1e-5), (loss2, ref2)

    print("KERNEL_OK")
</pallas_src>

<mosaic_0001>
module attributes {stable_mosaic.version = 11 : i64} {
  func.func @_inter_class_sep_kernel(%arg0: i32, %arg1: memref<8x12xf32, #tpu.memory_space<vmem>>, %arg2: memref<8x1xi32, #tpu.memory_space<vmem>>, %arg3: memref<1x8x128xf32, #tpu.memory_space<vmem>>) attributes {dimension_semantics = [#tpu.dimension_semantics<parallel>], iteration_bounds = array<i64: 1>, scalar_prefetch = 0 : i64, scratch_operands = 0 : i64, tpu.core_type = #tpu.core_type<tc>, window_params = [{transform_indices = @transform_0, window_bounds = array<i64: 8, 12>}, {transform_indices = @transform_1, window_bounds = array<i64: 8, 1>}, {transform_indices = @transform_2, window_bounds = array<i64: 1, 8, 128>}]} {
    %c0 = arith.constant 0 : index
    %c0_0 = arith.constant 0 : index
    %0 = vector.load %arg1[%c0, %c0_0] : memref<8x12xf32, #tpu.memory_space<vmem>>, vector<8x12xf32>
    %c0_1 = arith.constant 0 : index
    %c0_2 = arith.constant 0 : index
    %1 = vector.load %arg2[%c0_1, %c0_2] : memref<8x1xi32, #tpu.memory_space<vmem>>, vector<8x1xi32>
    %2 = tpu.iota {dimensions = array<i32: 1>} : vector<1x12xi32>
    %3 = vector.broadcast %2 : vector<1x12xi32> to vector<8x12xi32>
    %4 = vector.broadcast %1 : vector<8x1xi32> to vector<8x12xi32>
    %5 = arith.cmpi eq, %3, %4 : vector<8x12xi32>
    %cst = arith.constant 0.000000e+00 : f32
    %6 = vector.broadcast %cst : f32 to vector<8x12xf32>
    %7 = arith.select %5, %0, %6 : vector<8x12xi1>, vector<8x12xf32>
    %cst_3 = arith.constant dense<0.000000e+00> : vector<8xf32>
    %8 = vector.multi_reduction <add>, %7, %cst_3 [1] : vector<8x12xf32> to vector<8xf32>
    %9 = vector.shape_cast %8 : vector<8xf32> to vector<8x1xf32>
    %c8_i32 = arith.constant 8 : i32
    %10 = vector.broadcast %c8_i32 : i32 to vector<1x12xi32>
    %11 = arith.cmpi sge, %2, %10 : vector<1x12xi32>
    %cst_4 = arith.constant -3.40282347E+38 : f32
    %12 = vector.shape_cast %11 : vector<1x12xi1> to vector<1x12xi1>
    %13 = vector.broadcast %12 : vector<1x12xi1> to vector<8x12xi1>
    %14 = vector.broadcast %cst_4 : f32 to vector<8x12xf32>
    %15 = arith.select %13, %0, %14 : vector<8x12xi1>, vector<8x12xf32>
    %cst_5 = arith.constant 0.000000e+00 : f32
    %16 = vector.broadcast %cst_5 : f32 to vector<8x1xf32>
    %cst_6 = arith.constant dense<0xFF800000> : vector<8xf32>
    %17 = vector.multi_reduction <maximumf>, %15, %cst_6 [1] : vector<8x12xf32> to vector<8xf32>
    %18 = vector.shape_cast %17 : vector<8xf32> to vector<8x1xf32>
    %cst_7 = arith.constant 5.000000e-01 : f32
    %19 = vector.broadcast %cst_7 : f32 to vector<8x1xf32>
    %20 = arith.subf %19, %9 : vector<8x1xf32>
    %21 = arith.addf %20, %18 : vector<8x1xf32>
    %cst_8 = arith.constant 0.000000e+00 : f32
    %22 = vector.broadcast %cst_8 : f32 to vector<8x1xf32>
    %23 = arith.maximumf %21, %22 : vector<8x1xf32>
    %24 = arith.addf %16, %23 : vector<8x1xf32>
    %25 = vector.broadcast %18 : vector<8x1xf32> to vector<8x12xf32>
    %26 = arith.cmpf oeq, %15, %25 : vector<8x12xf32>
    %c12_i32 = arith.constant 12 : i32
    %27 = vector.shape_cast %2 : vector<1x12xi32> to vector<1x12xi32>
    %28 = vector.broadcast %27 : vector<1x12xi32> to vector<8x12xi32>
    %29 = vector.broadcast %c12_i32 : i32 to vector<8x12xi32>
    %30 = arith.select %26, %28, %29 : vector<8x12xi1>, vector<8x12xi32>
    %cst_9 = arith.constant dense<2147483647> : vector<8xi32>
    %31 = vector.multi_reduction <minsi>, %30, %cst_9 [1] : vector<8x12xi32> to vector<8xi32>
    %32 = vector.shape_cast %31 : vector<8xi32> to vector<8x1xi32>
    %33 = vector.broadcast %2 : vector<1x12xi32> to vector<8x12xi32>
    %34 = vector.broadcast %32 : vector<8x1xi32> to vector<8x12xi32>
    %35 = arith.cmpi eq, %33, %34 : vector<8x12xi32>
    %cst_10 = arith.constant -3.40282347E+38 : f32
    %36 = vector.broadcast %cst_10 : f32 to vector<8x12xf32>
    %37 = arith.select %35, %36, %15 : vector<8x12xi1>, vector<8x12xf32>
    %cst_11 = arith.constant dense<0xFF800000> : vector<8xf32>
    %38 = vector.multi_reduction <maximumf>, %37, %cst_11 [1] : vector<8x12xf32> to vector<8xf32>
    %39 = vector.shape_cast %38 : vector<8xf32> to vector<8x1xf32>
    %cst_12 = arith.constant 5.000000e-01 : f32
    %40 = vector.broadcast %cst_12 : f32 to vector<8x1xf32>
    %41 = arith.subf %40, %9 : vector<8x1xf32>
    %42 = arith.addf %41, %39 : vector<8x1xf32>
    %cst_13 = arith.constant 0.000000e+00 : f32
    %43 = vector.broadcast %cst_13 : f32 to vector<8x1xf32>
    %44 = arith.maximumf %42, %43 : vector<8x1xf32>
    %45 = arith.addf %24, %44 : vector<8x1xf32>
    %46 = tpu.iota {dimensions = array<i32: 0>} : vector<8x1xi32>
    %c8_i32_14 = arith.constant 8 : i32
    %47 = arith.muli %arg0, %c8_i32_14 : i32
    %48 = vector.broadcast %47 : i32 to vector<8x1xi32>
    %49 = arith.addi %48, %46 : vector<8x1xi32>
    %c8_i32_15 = arith.constant 8 : i32
    %50 = vector.broadcast %c8_i32_15 : i32 to vector<8x1xi32>
    %51 = arith.cmpi slt, %49, %50 : vector<8x1xi32>
    %c8_i32_16 = arith.constant 8 : i32
    %52 = vector.broadcast %c8_i32_16 : i32 to vector<8x1xi32>
    %53 = arith.cmpi slt, %1, %52 : vector<8x1xi32>
    %54 = arith.andi %53, %51 : vector<8x1xi1>
    %cst_17 = arith.constant 0.000000e+00 : f32
    %55 = vector.broadcast %cst_17 : f32 to vector<8x1xf32>
    %56 = arith.select %54, %45, %55 : vector<8x1xi1>, vector<8x1xf32>
    %57 = vector.shape_cast %56 : vector<8x1xf32> to vector<1x8x1xf32>
    %cst_18 = arith.constant dense<0.000000e+00> : vector<1xf32>
    %58 = vector.multi_reduction <add>, %57, %cst_18 [1, 2] : vector<1x8x1xf32> to vector<1xf32>
    %59 = vector.shape_cast %58 : vector<1xf32> to vector<1x1x1xf32>
    %60 = vector.extract %59[0, 0, 0] : f32 from vector<1x1x1xf32>
    %cst_19 = arith.constant 1.000000e+00 : f32
    %cst_20 = arith.constant 0.000000e+00 : f32
    %61 = vector.broadcast %cst_19 : f32 to vector<8x1xf32>
    %62 = vector.broadcast %cst_20 : f32 to vector<8x1xf32>
    %63 = arith.select %54, %61, %62 : vector<8x1xi1>, vector<8x1xf32>
    %64 = vector.shape_cast %63 : vector<8x1xf32> to vector<1x8x1xf32>
    %cst_21 = arith.constant dense<0.000000e+00> : vector<1xf32>
    %65 = vector.multi_reduction <add>, %64, %cst_21 [1, 2] : vector<1x8x1xf32> to vector<1xf32>
    %66 = vector.shape_cast %65 : vector<1xf32> to vector<1x1x1xf32>
    %67 = vector.extract %66[0, 0, 0] : f32 from vector<1x1x1xf32>
    %68 = tpu.iota {dimensions = array<i32: 0>} : vector<8x128xi32>
    %c0_i32 = arith.constant 0 : i32
    %69 = vector.broadcast %c0_i32 : i32 to vector<8x128xi32>
    %70 = arith.cmpi eq, %68, %69 : vector<8x128xi32>
    %c1_i32 = arith.constant 1 : i32
    %71 = vector.broadcast %c1_i32 : i32 to vector<8x128xi32>
    %72 = arith.cmpi eq, %68, %71 : vector<8x128xi32>
    %cst_22 = arith.constant 0.000000e+00 : f32
    %73 = vector.broadcast %67 : f32 to vector<8x128xf32>
    %74 = vector.broadcast %cst_22 : f32 to vector<8x128xf32>
    %75 = arith.select %72, %73, %74 : vector<8x128xi1>, vector<8x128xf32>
    %76 = vector.broadcast %60 : f32 to vector<8x128xf32>
    %77 = arith.select %70, %76, %75 : vector<8x128xi1>, vector<8x128xf32>
    %78 = vector.shape_cast %77 : vector<8x128xf32> to vector<1x8x128xf32>
    %c0_23 = arith.constant 0 : index
    %c0_24 = arith.constant 0 : index
    %c0_25 = arith.constant 0 : index
    %79 = vector.load %arg3[%c0_23, %c0_24, %c0_25] : memref<1x8x128xf32, #tpu.memory_space<vmem>>, vector<1x8x128xf32>
    tpu.vector_store %arg3[%c0_23, %c0_24, %c0_25], %78 {strides = array<i32>} : memref<1x8x128xf32, #tpu.memory_space<vmem>>, vector<1x8x128xf32>,
    return
  }
  func.func @transform_0(%arg0: i32) -> (i32, i32) {
    %c0_i32 = arith.constant 0 : i32
    %c0_i32_0 = arith.constant 0 : i32
    return %arg0, %c0_i32 : i32, i32
  }
  func.func @transform_1(%arg0: i32) -> (i32, i32) {
    %c0_i32 = arith.constant 0 : i32
    %c0_i32_0 = arith.constant 0 : i32
    return %arg0, %c0_i32 : i32, i32
  }
  func.func @transform_2(%arg0: i32) -> (i32, i32, i32) {
    %c0_i32 = arith.constant 0 : i32
    %c0_i32_0 = arith.constant 0 : i32
    %c0_i32_1 = arith.constant 0 : i32
    return %arg0, %c0_i32, %c0_i32_0 : i32, i32, i32
  }
}

</mosaic_0001>

<bundles_post_ra>
// kernel: tpu_custom_call.1
= control target key start
LH: loop header
LB: loop body
LE: loop exit
PB: predicated region body
PF: predicated region fallthrough
CT: control target
= control target key end

     0   :  { %v14_v0 = vlaneseq  ;;  %s177_s0 = inlined_call_operand.vmem [shape: f32[8,12], index: 0, kind: input, shape index: {}]   ;;  %s178_s1 = inlined_call_operand.vmem [shape: s32[8,1], index: 1, kind: input, shape index: {}]   ;;  %s179_s2 = inlined_call_operand.hbm [shape: f32[1,8,128], index: 2, kind: output, shape index: {}]  }
   0x1   :  { %7 = vsyncpa [#allocation3], 0  ;;  %v12_v1 = vld [vmem:[%s177_s0] sm:$0xff]  ;;  %vm21_vm0 = vcmask 97280   ;;  %v144_v10 = vmov 0   ;;  %vm70_vm7 = vcmask 7168  }
   0x2   :  { %v15_v2 = vand.u32 127, %v14_v0  ;;  %120 = vset.pattern.permute.xlu1 %v144_v10  ;;  %121 = vset.pattern.permute.xlu0 %v144_v10  ;;  %v13_v15 = vld [vmem:[%s178_s1] sm:$0xff]  ;;  %v145_v35 = vmov 0.0   ;;  %v62_v53 = vshrl.u32 %v14_v0, 7  ;;  %s146_s12 = smov [#allocation2]  }
   0x3   :  { %vm67_vm6 = vcmp.lt.s32.totalorder %v13_v15, 8  ;;  %s105_s13 = sshll.u32 %s146_s12, 4  ;;  %s106_s13 = int_to_ptr.vmem [resolvable:$true] %s105_s13 }
   0x4   :  { %vm25_vm1 = vcmp.ge.s32.totalorder %v15_v2, 8  ;;  %v81_v36 = vsel %vm67_vm6, 1.0, %v145_v35  ;;  %vm93_vm8 = vcmp.eq.s32.totalorder %v62_v53, 1  ;;  %vm92_vm9 = vcmp.eq.s32.totalorder %v62_v53, 0  ;;  %s122_s15 = scalar_lea.vmem %s106_s13, 128  ;;  %p127_p1 = scmp.lt.s32.totalorder %s106_s13, %s106_s13 }
   0x5   :  { %v28_v3 = vsel %vm25_vm1, %v12_v1, -3.4028235e+38  ;;  %v82_v38 = vsel %vm70_vm7, %v81_v36, 0.0  ;;  %p123_p0 = scmp.ne.s32.totalorder %s106_s13, %s122_s15  ;;  %p128_p2 = scmp.lt.s32.totalorder %s122_s15, %s122_s15 }
   0x6   :  { %v29_v4 = vsel %vm21_vm0, %v28_v3, -inf }
   0x7   :  { %30 = vmax.xlane.f32.xlu0 %v29_v4  ;;  %p129_p3 = por %p128_p2, %p127_p1 }
   0x9   :  { %p130_p4 = pnand %p129_p3, %p123_p0 }
  0x90   :  { %v31_v5 = vpop.xlane.xlu0 %30 }
  0x91   :  { %vm36_vm2 = vcmp.eq.f32.partialorder %v28_v3, %v31_v5 }
  0x92   :  { %v37_v6 = vsel %vm36_vm2, %v15_v2, 12 }
  0x93   :  { %v38_v7 = vsel %vm21_vm0, %v37_v6, 2147483647 }
  0x94   :  { %v40_v8 = vshra.s32 %v38_v7, 16  ;;  %v39_v11 = vand.u32 65535, %v38_v7 }
  0x96   :  { %v42_v9 = vcvt.s32.f32 %v40_v8  ;;  %v41_v13 = vcvt.s32.f32 %v39_v11 }
  0x98   :  { %43 = vmin.xlane.f32.xlu0 %v42_v9 }
 0x121   :  { %v44_v12 = vpop.xlane.xlu0 %43 }
 0x122   :  { %vm45_vm3 = vcmp.eq.f32.partialorder %v42_v9, %v44_v12  ;;  %v50_v16 = vcvt.f32.s32 %v44_v12 }
 0x123   :  { %v46_v14 = vsel %vm45_vm3, %v41_v13, inf }
 0x124   :  { %47 = vmin.xlane.f32.xlu1 %v46_v14  ;;  %v51_v18 = vshll.u32 %v50_v16, 16 }
 0x135   :  { %17 = vperm.xlu1 %120, %v13_v15  }
 0x1ad   :  { %v48_v17 = vpop.xlane.xlu1 %47 }
 0x1ae   :  { %v49_v19 = vcvt.f32.s32 %v48_v17 }
 0x1b0   :  { %v52_v20 = vadd.s32 %v51_v18, %v49_v19 }
 0x1b1   :  { %v18_v21 = vpop.permute.xlu1 %17 }
 0x1b2   :  { %vm19_vm4 = vcmp.eq.s32.totalorder %v15_v2, %v18_v21  ;;  %vm53_vm5 = vcmp.eq.s32.totalorder %v15_v2, %v52_v20 }
 0x1b3   :  { %v20_v22 = vsel %vm19_vm4, %v12_v1, 0.0  ;;  %v54_v24 = vsel %vm53_vm5, -3.4028235e+38, %v28_v3 }
 0x1b4   :  { %v22_v23 = vsel %vm21_vm0, %v20_v22, 0.0  ;;  %v55_v25 = vsel %vm21_vm0, %v54_v24, -inf }
 0x1b5   :  { %23 = vadd.xlane.f32.xlu0 %v22_v23 }
 0x1b9   :  { %56 = vmax.xlane.f32.xlu0 %v55_v25 }
 0x23e   :  { %v24_v26 = vpop.xlane.xlu0 %23 }
 0x23f   :  { %v32_v27 = vsub.f32 0.5, %v24_v26 }
 0x241   :  { %v33_v28 = vadd.f32 %v32_v27, %v31_v5 }
 0x242   :  { %v57_v29 = vpop.xlane.xlu0 %56 }
 0x243   :  { %v58_v30 = vadd.f32 %v57_v29, %v32_v27  ;;  %v34_v31 = vmax.f32 %v33_v28, 0.0 }
 0x245   :  { %v59_v32 = vmax.f32 %v58_v30, 0.0 }
 0x247   :  { %v60_v33 = vadd.f32 %v59_v32, %v34_v31 }
 0x249   :  { %v69_v34 = vsel %vm67_vm6, %v60_v33, 0.0 }
 0x24a   :  { %v71_v37 = vsel %vm70_vm7, %v69_v34, 0.0 }
 0x24b   :  { %72 = vadd.xlane.f32.xlu0 %v71_v37 }
 0x24f   :  { %83 = vadd.xlane.f32.xlu0 %v82_v38 }
 0x2d4   :  { %v73_v39 = vpop.xlane.xlu0 %72 }
 0x2d5   :  { %v74_v40 = vrot.slane %v73_v39, 4 }
 0x2d7   :  { %v75_v41 = vadd.f32 %v74_v40, %v73_v39 }
 0x2d8   :  { %v84_v42 = vpop.xlane.xlu0 %83 }
 0x2d9   :  { %v76_v43 = vrot.slane %v75_v41, 2  ;;  %v85_v44 = vrot.slane %v84_v42, 4 }
 0x2db   :  { %v86_v45 = vadd.f32 %v85_v44, %v84_v42  ;;  %v77_v46 = vadd.f32 %v76_v43, %v75_v41 }
 0x2dd   :  { %v87_v47 = vrot.slane %v86_v45, 2  ;;  %v78_v48 = vrot.slane %v77_v46, 1 }
 0x2df   :  { %v88_v49 = vadd.f32 %v87_v47, %v86_v45  ;;  %v79_v50 = vadd.f32 %v78_v48, %v77_v46 }
 0x2e1   :  { %113 = vpush %v79_v50  ;;  %v89_v51 = vrot.slane %v88_v49, 1 }
 0x2e3   :  { %v90_v52 = vadd.f32 %v89_v51, %v88_v49 }
 0x2e5   :  { %115 = vpush %v90_v52 }
 0x312   :  { %s114_s1 = spop %113 }
 0x313   :  { %v96_v55 = vstv %s114_s1 }
 0x316   :  { %s116_s14 = spop %115 }
 0x317   :  { %v94_v54 = vstv %s116_s14 }
 0x318   :  { %v95_v56 = vsel %vm93_vm8, %v94_v54, 0.0 }
 0x319   :  { %v97_v57 = vsel %vm92_vm9, %v96_v55, %v95_v56 }
 0x31a   :  { %98 = vst [vmem:[#allocation2] sm:$0xff] %v97_v57 }
 0x31b   :  { %133 = shalt.err (!%p130_p4)
}
 0x31c   :  { %108 = dma.vmem_to_hbm [thread:$0]  %s106_s13, 128, %s179_s2, [#allocation3]  }
 0x31d   :  { %142 = dma.done.wait [#allocation3], 128  }
 0x31e   :  { %143 = vsyncadd [#allocation3], 4294967168 }
 0x31f   :  { %112 = vsyncpa [#allocation3], 1 }

</bundles_post_ra>
